<compile_context>
chip_gen: v7x
topology: tpu7x:2x2x1
jax: 0.10.0
libtpu: 0.0.40
codegen_flags: <defaults>
</compile_context>

<pallas_src>
import jax
import jax.numpy as jnp
from jax.experimental import pallas as pl
from jax.experimental.pallas import tpu as pltpu


def _round_up(n, m):
    return ((n + m - 1) // m) * m


def _cdiv(a, b):
    return (a + b - 1) // b


# ----------------------------------------------------------------------------
# Kernel
# ----------------------------------------------------------------------------
def net_kernel(x_ref, w1_ref, w2_ref, wo_ref, b_ref, o_ref):
    n_mid = w1_ref.shape[1]
    n_out = o_ref.shape[0]          # output is stored transposed: (n_out, tile_b)
    cd = w1_ref.dtype               # compute dtype (f32 or bf16); accumulation f32

    # Packed biases: row 0 = b1, row 1 = b2, row 2 = folded head bias (f32).
    b1 = b_ref[0:1, :n_mid]
    b2 = b_ref[1:2, :n_mid]
    bo = b_ref[2:3, :n_out]

    x = x_ref[...].astype(cd)

    # fc1 + relu — materialize the intermediate once in the compute dtype
    # (bf16 path: halves VMEM store/load traffic of the (tile_b, n_mid) temp).
    h1 = jnp.maximum(
        jnp.dot(x, w1_ref[...], preferred_element_type=jnp.float32) + b1, 0.0
    ).astype(cd)

    # fc2 + relu
    h2 = jnp.maximum(
        jnp.dot(h1, w2_ref[...], preferred_element_type=jnp.float32) + b2, 0.0
    ).astype(cd)

    # Fused dueling head: single matmul with pre-folded weights/bias (f32).
    out = jnp.dot(h2, wo_ref[...], preferred_element_type=jnp.float32) + bo

    # Lane-dense store: transpose the small (tile_b, n_out) result on the XLU
    # (idle in this kernel) so the store is unmasked full-lane `vst`.
    o_ref[...] = out.T.astype(o_ref.dtype)


# ----------------------------------------------------------------------------
# Host-side parameter preparation (fold + pack + optional bf16 cast)
# ----------------------------------------------------------------------------
def prepare_params(raw_params, compute_dtype=jnp.float32):
    """Fold the dueling combine into one head and pack biases.

    raw_params: (w1, b1, w2, b2, wa, ba, wv, bv) with weights (in, out) and
    biases (1, out).  Returns (w1, w2, w_out, bias_pack) kernel operands.
    """
    w1, b1, w2, b2, wa, ba, wv, bv = raw_params
    # out = val + adv - mean_a(adv)  ==  h2 @ w_out + b_out  (exact algebra)
    w_out = wa - jnp.mean(wa, axis=1, keepdims=True) + wv        # (n_mid, n_out)
    b_out = ba - jnp.mean(ba, axis=1, keepdims=True) + bv        # (1,     n_out)

    n_mid = w1.shape[1]
    n_out = wa.shape[1]
    width = max(n_mid, n_out)

    def _pad(b):
        return jnp.pad(b, ((0, 0), (0, width - b.shape[1])))

    bias_pack = jnp.concatenate([_pad(b1), _pad(b2), _pad(b_out)], axis=0)
    bias_pack = bias_pack.astype(jnp.float32)                    # (3, width)

    cd = compute_dtype
    return (w1.astype(cd), w2.astype(cd), w_out.astype(cd), bias_pack)


# ----------------------------------------------------------------------------
# Tiling / VMEM-budget helpers
# ----------------------------------------------------------------------------
def _default_tile_b_cap():
    """Bigger tiles on 128-MiB-VMEM generations (v5e/v6e); 8192 on v7x (64 MiB)."""
    try:
        vmem = pltpu.get_tpu_info().vmem_capacity_bytes
    except Exception:
        return 8192
    return 16384 if vmem >= 96 * 1024 * 1024 else 8192


def _choose_tiling(B, tile_b_cap):
    """Balanced batch tiling.

    Guarantees >= 2 grid steps whenever B > 128 (so the "parallel" batch axis
    can shard over both v7x TensorCores) and keeps tile_b a multiple of 128 so
    the lane-dense transposed output store is unmasked.  Pad waste is bounded
    by < 128 rows per tile.  For tiny batches a single full-extent tile is used.
    """
    if B <= 128:
        b_pad = _round_up(max(B, 8), 8)
        return b_pad, b_pad, 1
    num_tiles = max(2, _cdiv(B, tile_b_cap))
    tile_b = _round_up(_cdiv(B, num_tiles), 128)
    b_pad = tile_b * num_tiles
    return b_pad, tile_b, num_tiles


def _vmem_limit_bytes(tile_b, n_in, n_mid, n_out, x_bytes, w_bytes, out_bytes):
    """Scoped-VMEM budget derived from the actual per-step footprint.

    Double-buffered x tiles + double-buffered output slabs + resident weights
    + worst-case f32 intermediates, with 2x headroom; clamped to [32, 48] MiB
    so it is always safe within v7x's 64 MiB physical VMEM.
    """
    x_buf = 2 * tile_b * n_in * x_bytes
    out_buf = 2 * n_out * tile_b * out_bytes
    w_buf = 2 * ((n_in * n_mid + n_mid * n_mid + n_mid * n_out) * w_bytes
                 + 3 * max(n_mid, n_out) * 4)
    inter = 2 * tile_b * n_mid * 4 + tile_b * n_out * 4
    est = x_buf + out_buf + w_buf + inter
    return int(min(48 * 1024 * 1024, max(32 * 1024 * 1024, 2 * est)))


# ----------------------------------------------------------------------------
# Wrapper
# ----------------------------------------------------------------------------
def net_forward(x, kernel_params, tile_b_cap=None, out_dtype=jnp.float32):
    w1, w2, wo, bias_pack = kernel_params
    n_in, n_mid = w1.shape
    n_out = wo.shape[1]
    B = x.shape[0]

    if tile_b_cap is None:
        tile_b_cap = _default_tile_b_cap()

    # NOTE: x deliberately NOT cast to the compute dtype on the host — the
    # in-kernel VPU cast is free, a host cast would add a full extra pass over x.
    b_pad, tile_b, num_tiles = _choose_tiling(B, tile_b_cap)
    if b_pad != B:
        x = jnp.pad(x, ((0, b_pad - B), (0, 0)))

    vmem_limit = _vmem_limit_bytes(
        tile_b, n_in, n_mid, n_out,
        x_bytes=x.dtype.itemsize, w_bytes=w1.dtype.itemsize,
        out_bytes=jnp.dtype(out_dtype).itemsize)

    out_t = pl.pallas_call(
        net_kernel,
        # Output stored transposed (n_out, b_pad): lane-dense, no lane padding.
        out_shape=jax.ShapeDtypeStruct((n_out, b_pad), out_dtype),
        grid_spec=pltpu.PrefetchScalarGridSpec(
            num_scalar_prefetch=0,
            grid=(num_tiles,),
            in_specs=[
                pl.BlockSpec((tile_b, n_in), lambda i: (i, 0)),      # x tile
                pl.BlockSpec(w1.shape, lambda i: (0, 0)),            # resident
                pl.BlockSpec(w2.shape, lambda i: (0, 0)),            # resident
                pl.BlockSpec(wo.shape, lambda i: (0, 0)),            # resident
                pl.BlockSpec(bias_pack.shape, lambda i: (0, 0)),     # resident
            ],
            out_specs=pl.BlockSpec((n_out, tile_b), lambda i: (0, i)),
        ),
        compiler_params=pltpu.CompilerParams(
            dimension_semantics=("parallel",),   # v7x: shard batch over 2 TCs
            vmem_limit_bytes=vmem_limit,
        ),
    )(x, w1, w2, wo, bias_pack)

    # Fix layout back to (B, n_out) on the host (tiny: B * n_out elements).
    return out_t[:, :B].T


# ----------------------------------------------------------------------------
# Init + pure-JAX reference of the PyTorch forward
# ----------------------------------------------------------------------------
def init_params(key, n_in, n_mid, n_out):
    """Deterministic init mirroring nn.Linear shapes (weights stored (in, out))."""
    ks = jax.random.split(key, 8)

    def lin(kw, kb, fan_in, fan_out):
        bound = 1.0 / jnp.sqrt(jnp.float32(fan_in))
        w = jax.random.uniform(kw, (fan_in, fan_out), jnp.float32, -bound, bound)
        b = jax.random.uniform(kb, (1, fan_out), jnp.float32, -bound, bound)
        return w, b

    w1, b1 = lin(ks[0], ks[1], n_in, n_mid)
    w2, b2 = lin(ks[2], ks[3], n_mid, n_mid)
    wa, ba = lin(ks[4], ks[5], n_mid, n_out)
    wv, bv = lin(ks[6], ks[7], n_mid, 1)
    return (w1, b1, w2, b2, wa, ba, wv, bv)


def net_forward_ref(x, raw_params):
    """Unfused pure-JAX reference matching the PyTorch module exactly."""
    w1, b1, w2, b2, wa, ba, wv, bv = raw_params
    h1 = jax.nn.relu(x @ w1 + b1)
    h2 = jax.nn.relu(h1 @ w2 + b2)
    adv = h2 @ wa + ba
    val = h2 @ wv + bv                      # (B, 1) broadcasts like .expand
    return val + adv - jnp.mean(adv, axis=1, keepdims=True)


if __name__ == "__main__":
    key = jax.random.PRNGKey(0)
    k_x, k_p, k_x2 = jax.random.split(key, 3)

    n_in, n_mid, n_out = 32, 64, 4
    raw = init_params(k_p, n_in, n_mid, n_out)
    params_f32 = prepare_params(raw, jnp.float32)
    params_bf16 = prepare_params(raw, jnp.bfloat16)

    # --- small batch, single tile ---
    B = 8
    x = jax.random.normal(k_x, (B, n_in), jnp.float32)
    ref = net_forward_ref(x, raw)

    out_f32 = jax.block_until_ready(net_forward(x, params_f32))
    assert out_f32.shape == (B, n_out)
    assert jnp.allclose(out_f32, ref, atol=1e-5, rtol=1e-5)

    out_bf16 = jax.block_until_ready(net_forward(x, params_bf16))
    assert out_bf16.shape == (B, n_out)
    assert jnp.allclose(out_bf16, ref, atol=5e-2, rtol=5e-2)

    # --- larger batch: exercises multi-tile grid (>=2 steps) + pad/slice path ---
    B2 = 300
    x2 = jax.random.normal(k_x2, (B2, n_in), jnp.float32)
    ref2 = net_forward_ref(x2, raw)
    out2 = jax.block_until_ready(net_forward(x2, params_f32))
    assert out2.shape == (B2, n_out)
    assert jnp.allclose(out2, ref2, atol=1e-5, rtol=1e-5)

    print("KERNEL_OK")
</pallas_src>

<mosaic_0001>
module attributes {stable_mosaic.version = 11 : i64} {
  func.func @net_kernel(%arg0: i32, %arg1: memref<8x32xf32, #tpu.memory_space<vmem>>, %arg2: memref<32x64xf32, #tpu.memory_space<vmem>>, %arg3: memref<64x64xf32, #tpu.memory_space<vmem>>, %arg4: memref<64x4xf32, #tpu.memory_space<vmem>>, %arg5: memref<3x64xf32, #tpu.memory_space<vmem>>, %arg6: memref<4x8xf32, #tpu.memory_space<vmem>>) attributes {dimension_semantics = [#tpu.dimension_semantics<parallel>], iteration_bounds = array<i64: 1>, scalar_prefetch = 0 : i64, scratch_operands = 0 : i64, tpu.core_type = #tpu.core_type<tc>, window_params = [{transform_indices = @transform_0, window_bounds = array<i64: 8, 32>}, {pipeline_mode = #tpu.pipeline_mode<synchronous>, transform_indices = @transform_1, window_bounds = array<i64: 32, 64>}, {pipeline_mode = #tpu.pipeline_mode<synchronous>, transform_indices = @transform_2, window_bounds = array<i64: 64, 64>}, {pipeline_mode = #tpu.pipeline_mode<synchronous>, transform_indices = @transform_3, window_bounds = array<i64: 64, 4>}, {pipeline_mode = #tpu.pipeline_mode<synchronous>, transform_indices = @transform_4, window_bounds = array<i64: 3, 64>}, {transform_indices = @transform_5, window_bounds = array<i64: 4, 8>}]} {
    %c0 = arith.constant 0 : index
    %c0_0 = arith.constant 0 : index
    %0 = vector.load %arg5[%c0, %c0_0] : memref<3x64xf32, #tpu.memory_space<vmem>>, vector<1x64xf32>
    %c1 = arith.constant 1 : index
    %c0_1 = arith.constant 0 : index
    %1 = vector.load %arg5[%c1, %c0_1] : memref<3x64xf32, #tpu.memory_space<vmem>>, vector<1x64xf32>
    %c2 = arith.constant 2 : index
    %c0_2 = arith.constant 0 : index
    %2 = vector.load %arg5[%c2, %c0_2] : memref<3x64xf32, #tpu.memory_space<vmem>>, vector<1x4xf32>
    %c0_3 = arith.constant 0 : index
    %c0_4 = arith.constant 0 : index
    %3 = vector.load %arg1[%c0_3, %c0_4] : memref<8x32xf32, #tpu.memory_space<vmem>>, vector<8x32xf32>
    %c0_5 = arith.constant 0 : index
    %c0_6 = arith.constant 0 : index
    %4 = vector.load %arg2[%c0_5, %c0_6] : memref<32x64xf32, #tpu.memory_space<vmem>>, vector<32x64xf32>
    %cst = arith.constant dense<0.000000e+00> : vector<8x64xf32>
    %5 = tpu.matmul %3, %4, %cst {dimension_numbers = #tpu.dot_dimension_numbers<[1], [0], [0], [1], [0, 0, 1, 1], [], []>} : vector<8x32xf32>, vector<32x64xf32>, vector<8x64xf32> -> vector<8x64xf32>
    %6 = vector.broadcast %0 : vector<1x64xf32> to vector<8x64xf32>
    %7 = arith.addf %5, %6 : vector<8x64xf32>
    %cst_7 = arith.constant 0.000000e+00 : f32
    %8 = vector.broadcast %cst_7 : f32 to vector<8x64xf32>
    %9 = arith.maximumf %7, %8 : vector<8x64xf32>
    %c0_8 = arith.constant 0 : index
    %c0_9 = arith.constant 0 : index
    %10 = vector.load %arg3[%c0_8, %c0_9] : memref<64x64xf32, #tpu.memory_space<vmem>>, vector<64x64xf32>
    %cst_10 = arith.constant dense<0.000000e+00> : vector<8x64xf32>
    %11 = tpu.matmul %9, %10, %cst_10 {dimension_numbers = #tpu.dot_dimension_numbers<[1], [0], [0], [1], [0, 0, 1, 1], [], []>} : vector<8x64xf32>, vector<64x64xf32>, vector<8x64xf32> -> vector<8x64xf32>
    %12 = vector.broadcast %1 : vector<1x64xf32> to vector<8x64xf32>
    %13 = arith.addf %11, %12 : vector<8x64xf32>
    %cst_11 = arith.constant 0.000000e+00 : f32
    %14 = vector.broadcast %cst_11 : f32 to vector<8x64xf32>
    %15 = arith.maximumf %13, %14 : vector<8x64xf32>
    %c0_12 = arith.constant 0 : index
    %c0_13 = arith.constant 0 : index
    %16 = vector.load %arg4[%c0_12, %c0_13] : memref<64x4xf32, #tpu.memory_space<vmem>>, vector<64x4xf32>
    %cst_14 = arith.constant dense<0.000000e+00> : vector<8x4xf32>
    %17 = tpu.matmul %15, %16, %cst_14 {dimension_numbers = #tpu.dot_dimension_numbers<[1], [0], [0], [1], [0, 0, 1, 1], [], []>} : vector<8x64xf32>, vector<64x4xf32>, vector<8x4xf32> -> vector<8x4xf32>
    %18 = vector.broadcast %2 : vector<1x4xf32> to vector<8x4xf32>
    %19 = arith.addf %17, %18 : vector<8x4xf32>
    %20 = tpu.transpose %19, [1, 0] : vector<8x4xf32> -> vector<4x8xf32>
    %c0_15 = arith.constant 0 : index
    %c0_16 = arith.constant 0 : index
    %21 = vector.load %arg6[%c0_15, %c0_16] : memref<4x8xf32, #tpu.memory_space<vmem>>, vector<4x8xf32>
    tpu.vector_store %arg6[%c0_15, %c0_16], %20 {strides = array<i32>} : memref<4x8xf32, #tpu.memory_space<vmem>>, vector<4x8xf32>,
    return
  }
  func.func @transform_0(%arg0: i32) -> (i32, i32) {
    %c0_i32 = arith.constant 0 : i32
    %c0_i32_0 = arith.constant 0 : i32
    return %arg0, %c0_i32 : i32, i32
  }
  func.func @transform_1(%arg0: i32) -> (i32, i32) {
    %c0_i32 = arith.constant 0 : i32
    %c0_i32_0 = arith.constant 0 : i32
    %c0_i32_1 = arith.constant 0 : i32
    return %c0_i32, %c0_i32_0 : i32, i32
  }
  func.func @transform_2(%arg0: i32) -> (i32, i32) {
    %c0_i32 = arith.constant 0 : i32
    %c0_i32_0 = arith.constant 0 : i32
    %c0_i32_1 = arith.constant 0 : i32
    return %c0_i32, %c0_i32_0 : i32, i32
  }
  func.func @transform_3(%arg0: i32) -> (i32, i32) {
    %c0_i32 = arith.constant 0 : i32
    %c0_i32_0 = arith.constant 0 : i32
    %c0_i32_1 = arith.constant 0 : i32
    return %c0_i32, %c0_i32_0 : i32, i32
  }
  func.func @transform_4(%arg0: i32) -> (i32, i32) {
    %c0_i32 = arith.constant 0 : i32
    %c0_i32_0 = arith.constant 0 : i32
    %c0_i32_1 = arith.constant 0 : i32
    return %c0_i32, %c0_i32_0 : i32, i32
  }
  func.func @transform_5(%arg0: i32) -> (i32, i32) {
    %c0_i32 = arith.constant 0 : i32
    %c0_i32_0 = arith.constant 0 : i32
    return %c0_i32, %arg0 : i32, i32
  }
}

</mosaic_0001>

<bundles_post_ra>
// kernel: tpu_custom_call.1
= control target key start
LH: loop header
LB: loop body
LE: loop exit
PB: predicated region body
PF: predicated region fallthrough
CT: control target
= control target key end

     0   :  { %10 = vsyncpa [#allocation3], 0  ;;  %s630_s0 = inlined_call_operand.vmem [shape: f32[8,32], index: 0, kind: input, shape index: {}]   ;;  %s631_s1 = inlined_call_operand.hbm [shape: f32[32,64], index: 1, kind: input, shape index: {}]   ;;  %s632_s2 = inlined_call_operand.vmem [shape: f32[64,64], index: 2, kind: input, shape index: {}]   ;;  %s633_s3 = inlined_call_operand.vmem [shape: f32[64,4], index: 3, kind: input, shape index: {}]   ;;  %s634_s4 = inlined_call_operand.vmem [shape: f32[3,64], index: 4, kind: input, shape index: {}]   ;;  %s635_s5 = inlined_call_operand.hbm [shape: f32[4,8], index: 5, kind: output, shape index: {}]  }
   0x1   :  { %11 = vsyncpa [#allocation4], 0  ;;  %s506_s18 = smov [#allocation2]   ;;  %s458_s22 = scalar_lea.hbm %s631_s1, 512 }
   0x2   :  { %s19_s19 = sshll.u32 %s506_s18, 4  ;;  %p459_p0 = scmp.ne.s32.totalorder %s631_s1, %s458_s22  ;;  %s20_s19 = int_to_ptr.vmem [resolvable:$true] %s19_s19 }
   0x3   :  { %p462_p1 = scmp.lt.u32.totalorder %s458_s22, %s631_s1 }
   0x5   :  { %p464_p2 = pnand %p462_p1, %p459_p0 }
   0x7   :  { %467 = shalt.err (!%p464_p2)
}
   0x8   :  { %s468_s27 = scalar_lea.vmem %s20_s19, 512  ;;  %p473_p4 = scmp.lt.s32.totalorder %s20_s19, %s20_s19 }
   0x9   :  { %p469_p3 = scmp.ne.s32.totalorder %s20_s19, %s468_s27  ;;  %p474_p5 = scmp.lt.s32.totalorder %s468_s27, %s468_s27 }
   0xb   :  { %p475_p6 = por %p474_p5, %p473_p4 }
   0xd   :  { %p476_p7 = pnand %p475_p6, %p469_p3 }
   0xf   :  { %479 = shalt.err (!%p476_p7)
}
  0x10   :  { %s507_s28 = smov 128   ;;  %s508_s29 = smov 8  }
  0x11   :  { %25 = dma.hbm_to_vmem [thread:$0]  %s631_s1, 512, %s20_s19, [#allocation3], %s507_s28, %s507_s28, %s508_s29  }
  0x12   :  { %502 = dma.done.wait [#allocation3], 512  }
  0x13   :  { %503 = vsyncadd [#allocation3], 4294966784  ;;  %v509_v0 = vmov 0.0|0.0   ;;  %vm510_vm0 = vmmov 0   ;;  %v511_v1 = vmov 0.0   ;;  %v39_v2 = vld [vmem:[#allocation2] sm:$0xff] }
  0x14   :  { %421 = vmatprep.subr.bf16.mxu0 %v509_v0  ;;  %380 = vmatprep.mubr.msk.f32.mxu0 %vm510_vm0, %v511_v1  ;;  %v40_v3 = vld [vmem:[#allocation2 + $0x8] sm:$0xff]  ;;  %v41_v4 = vld [vmem:[#allocation2 + $0x10] sm:$0xff]  ;;  %v42_v6 = vld [vmem:[#allocation2 + $0x18] sm:$0xff]  ;;  %vm47_vm1 = vcmask 261120   ;;  %vm134_vm2 = vcmask 523264   ;;  %vm326_vm3 = vcmask 60416  }
  0x15   :  { %427 = vmatprep.subr.bf16.mxu1 %v509_v0  ;;  %399 = vmatprep.mubr.msk.f32.mxu1 %vm510_vm0, %v511_v1  ;;  %v422_v5 = vpack.c.bf16 %v40_v3, %v39_v2  ;;  %v122_v7 = vld [vmem:[%s632_s2] sm:$0xff]  ;;  %v123_v8 = vld [vmem:[%s632_s2 + $0x8] sm:$0xff]  ;;  %v124_v9 = vld [vmem:[%s632_s2 + $0x10] sm:$0xff]  ;;  %v425_v11 = vpack.c.bf16 %v42_v6, %v41_v4 }
  0x16   :  { %v125_v10 = vld [vmem:[%s632_s2 + $0x18] sm:$0xff]  ;;  %v428_v12 = vpack.c.bf16 %v123_v8, %v122_v7  ;;  %v126_v14 = vld [vmem:[%s632_s2 + $0x20] sm:$0xff]  ;;  %v127_v15 = vld [vmem:[%s632_s2 + $0x28] sm:$0xff] }
  0x17   :  { %423 = vmatpush3.bf16.msra.mxu0 %v422_v5  ;;  %v431_v13 = vpack.c.bf16 %v125_v10, %v124_v9  ;;  %v38_v16 = vld [vmem:[%s630_s0] sm:$0xff]  ;;  %v434_v17 = vpack.c.bf16 %v127_v15, %v126_v14  ;;  %v128_v18 = vld [vmem:[%s632_s2 + $0x30] sm:$0xff]  ;;  %v129_v19 = vld [vmem:[%s632_s2 + $0x38] sm:$0xff] }
  0x18   :  { %424 = vmatprep.subr.bf16.mxu0 %v509_v0  ;;  %429 = vmatpush3.bf16.msra.mxu1 %v428_v12  ;;  %v437_v20 = vpack.c.bf16 %v129_v19, %v128_v18  ;;  %v209_v21 = vld [vmem:[%s633_s3] sm:$0xff]  ;;  %v210_v22 = vld [vmem:[%s633_s3 + $0x8] sm:$0xff]  ;;  %v211_v23 = vld [vmem:[%s633_s3 + $0x10] sm:$0xff] }
  0x19   :  { %430 = vmatprep.subr.bf16.mxu1 %v509_v0  ;;  %v440_v24 = vpack.c.bf16 %v210_v22, %v209_v21  ;;  %v212_v25 = vld [vmem:[%s633_s3 + $0x18] sm:$0xff]  ;;  %v213_v27 = vld [vmem:[%s633_s3 + $0x20] sm:$0xff]  ;;  %v214_v28 = vld [vmem:[%s633_s3 + $0x28] sm:$0xff] }
  0x1a   :  { %v443_v26 = vpack.c.bf16 %v212_v25, %v211_v23  ;;  %v446_v29 = vpack.c.bf16 %v214_v28, %v213_v27  ;;  %v343_v30 = vld [vmem:[%s634_s4] ss:$0 sm:$0xff]  ;;  %v215_v35 = vld [vmem:[%s633_s3 + $0x30] sm:$0xff]  ;;  %v216_v36 = vld [vmem:[%s633_s3 + $0x38] sm:$0xff]  ;;  %s512_s3 = smov [#allocation5]  }
  0x1b   :  { %426 = vmatpush3.bf16.msra.mxu0 %v425_v11  ;;  %v449_v37 = vpack.c.bf16 %v216_v36, %v215_v35  ;;  %v345_v38 = vld [vmem:[%s634_s4 + $0x1] ss:$0 sm:$0xff]  ;;  %v347_v43 = vld [vmem:[%s634_s4 + $0x2] ss:$0 sm:$0xff]  ;;  %s334_s18 = sshll.u32 %s512_s3, 4  ;;  %s335_s18 = int_to_ptr.vmem [resolvable:$true] %s334_s18 }
  0x1c   :  { %439 = vmatprep.subr.bf16.mxu0 %v509_v0  ;;  %432 = vmatpush3.bf16.msra.mxu1 %v431_v13  ;;  %s480_s19 = scalar_lea.vmem %s335_s18, 64  ;;  %p485_p9 = scmp.lt.s32.totalorder %s335_s18, %s335_s18 }
  0x1d   :  { %433 = vmatprep.subr.bf16.mxu1 %v509_v0  ;;  %p481_p8 = scmp.ne.s32.totalorder %s335_s18, %s480_s19  ;;  %p486_p10 = scmp.lt.s32.totalorder %s480_s19, %s480_s19 }
  0x1e   :  { %381 = vmatmul.mubr.msk.f32.vlgmr.msra.gmra.mrb[0].mxu0 %vm47_vm1, %v38_v16 }
  0x1f   :  { %418 = vmatprep.mubr.msk.f32.mxu0 %vm510_vm0, %v511_v1  ;;  %441 = vmatpush3.bf16.msra.mxu0 %v440_v24  ;;  %p487_p11 = por %p486_p10, %p485_p9 }
  0x20   :  { %435 = vmatpush3.bf16.msra.mxu1 %v434_v17  ;;  %442 = vmatprep.subr.bf16.mxu0 %v509_v0 }
  0x21   :  { %436 = vmatprep.subr.bf16.mxu1 %v509_v0  ;;  %p488_p12 = pnand %p487_p11, %p481_p8 }
  0x23   :  { %444 = vmatpush3.bf16.msra.mxu0 %v443_v26 }
  0x24   :  { %438 = vmatpush3.bf16.msra.mxu1 %v437_v20  ;;  %445 = vmatprep.subr.bf16.mxu0 %v509_v0 }
  0x27   :  { %447 = vmatpush3.bf16.msra.mxu0 %v446_v29 }
  0x28   :  { %448 = vmatprep.subr.bf16.mxu0 %v509_v0 }
  0x2b   :  { %450 = vmatpush3.bf16.msra.mxu0 %v449_v37 }
  0xf1   :  { %v117_v31 = vpop.f32.mrb[0].mxu0 }
  0xf2   :  { %v118_v32 = vadd.f32 %v343_v30, %v117_v31  ;;  %v382_v33 = vpop.f32.mrb[1].mxu0 }
  0xf4   :  { %v121_v34 = vmax.f32 %v118_v32, 0.0 }
  0xf6   :  { %400 = vmatmul.mubr.msk.f32.vlgmr.msra.gmra.mrb[0].mxu1 %vm134_vm2, %v121_v34 }
 0x1c9   :  { %v204_v39 = vpop.f32.mrb[0].mxu1 }
 0x1ca   :  { %v205_v40 = vadd.f32 %v345_v38, %v204_v39  ;;  %v401_v41 = vpop.f32.mrb[1].mxu1 }
 0x1cc   :  { %v208_v42 = vmax.f32 %v205_v40, 0.0 }
 0x1ce   :  { %419 = vmatmul.mubr.msk.f32.vlgmr.msra.gmra.mrb[2].mxu0 %vm134_vm2, %v208_v42 }
 0x2a1   :  { %v290_v44 = vpop.f32.mrb[2].mxu0 }
 0x2a2   :  { %v420_v45 = vpop.f32.mrb[3].mxu0  ;;  %v291_v46 = vadd.f32 %v347_v43, %v290_v44 }
 0x2a4   :  { %294 = vxpose.xlu0.b32.start.end [1/1] (short) (narrow) %v291_v46, 8 }
 0x324   :  { %v310_v47 = vpop.trf.xlu0 }
 0x325   :  { %327 = vst.msk [vmem:[#allocation5] sm:$0xf] %vm326_vm3, %v310_v47 }
 0x326   :  { %491 = shalt.err (!%p488_p12)
}
 0x327   :  { %s492_s4 = scalar_lea.hbm %s635_s5, 64 }
 0x328   :  { %p493_p13 = scmp.ne.s32.totalorder %s635_s5, %s492_s4  ;;  %p496_p0 = scmp.lt.u32.totalorder %s492_s4, %s635_s5 }
 0x32a   :  { %p498_p1 = pnand %p496_p0, %p493_p13 }
 0x32c   :  { %501 = shalt.err (!%p498_p1)
}
 0x32d   :  { %337 = dma.vmem_to_hbm [thread:$0]  %s335_s18, 64, %s635_s5, [#allocation4]  }
 0x32e   :  { %504 = dma.done.wait [#allocation4], 64  }
 0x32f   :  { %505 = vsyncadd [#allocation4], 4294967232 }
 0x330   :  { %341 = vsyncpa [#allocation3], 1 }
 0x331   :  { %342 = vsyncpa [#allocation4], 1 }

</bundles_post_ra>
